<compile_context>
chip_gen: v7x
topology: tpu7x:2x2x1
jax: 0.10.0
libtpu: 0.0.40
codegen_flags: <defaults>
</compile_context>

<pallas_src>
from functools import partial

import jax
import jax.numpy as jnp
from jax.experimental import pallas as pl
from jax.experimental.pallas import tpu as pltpu


def _round_up(x, m):
    return (x + m - 1) // m * m


def _vmem_capacity_bytes():
    # 64 MiB per TC on v7x, 128 MiB on v5e/v6e; fall back if the query fails.
    try:
        return int(pltpu.get_tpu_info().vmem_capacity_bytes)
    except Exception:
        return 128 << 20


def _plan_strip(B, H, Wp, Cp, in_item, out_item, vmem_cap):
    """Pick the output-strip height TH and strip count nS."""
    # Budget for everything that scales with TH (double-buffered input/output
    # tiles, the kx-folded concat operand, the reshaped LHS, two live f32
    # dot results) — generation aware.
    budget = max(4 << 20, min(24 << 20, vmem_cap // 5))
    per_row = Wp * Cp * (2 * in_item        # input tile (double buffered)
                         + 3 * in_item      # kx-folded concat operand
                         + 3 * in_item      # reshaped per-ky LHS
                         + 2 * 4            # two live f32 matmul results
                         + 2 * out_item)    # output tile (double buffered)
    TH = max(1, min(H, budget // per_row))
    nS = -(-H // TH)
    # Give the DMA pipeline (and v7x's 2 TensorCores) at least ~4 grid steps.
    while B * nS < 4 and TH > 8:
        TH = max(8, -(-TH // 2))
        nS = -(-H // TH)
    return TH, nS


def conv3x3_kernel(x_ref, w_ref, o_ref):
    # x_ref: (TH+2, Wp+2, Cp)  haloed, zero-padded input window (compute dtype)
    # w_ref: (3, 3*Cp, Cp)     ky-major, (kx, ci)-folded weights (compute dtype)
    # o_ref: (TH, Wp, Cp)      output strip (storage dtype); Wp % 8 == 0, Cp % 128 == 0
    TH, Wp, Cp = o_ref.shape
    K = 3 * Cp

    # Fold the three kx taps into the contraction: one lane-axis concat built
    # once per tile.  The ky shifts below are free leading-dim slices.
    lhs_all = jnp.concatenate(
        [x_ref[:, 0:Wp, :], x_ref[:, 1:Wp + 1, :], x_ref[:, 2:Wp + 2, :]],
        axis=-1)                                            # (TH+2, Wp, 3*Cp)

    def tap(ky):
        # (TH, Wp) -> M merge is free because Wp is a multiple of the sublane tile.
        lhs = lhs_all[ky:ky + TH].reshape(TH * Wp, K)
        return jax.lax.dot_general(
            lhs, w_ref[ky],
            dimension_numbers=(((1,), (0,)), ((), ())),
            preferred_element_type=jnp.float32)             # (TH*Wp, Cp) f32

    acc = tap(0)            # first tap written directly — no zero-init pass
    acc = acc + tap(1)
    acc = acc + tap(2)
    o_ref[...] = acc.reshape(TH, Wp, Cp).astype(o_ref.dtype)


def _conv3x3_call(x_arg, w3, in_spec_x, B, nS, TH, Wp, Cp,
                  out_dtype, compute_dtype, vmem_cap):
    in_item = jnp.dtype(compute_dtype).itemsize
    out_item = jnp.dtype(out_dtype).itemsize
    H_pad = nS * TH

    # Live-VMEM estimate: double-buffered input/output tiles + weights + the
    # kx-folded concat operand + one reshaped LHS + two f32 dot results.
    in_tile = (TH + 2) * (Wp + 2) * Cp * in_item
    concat = (TH + 2) * Wp * 3 * Cp * in_item
    lhs = TH * Wp * 3 * Cp * in_item
    accf32 = 2 * TH * Wp * Cp * 4
    out_tile = TH * Wp * Cp * out_item
    wts = 3 * (3 * Cp) * Cp * in_item
    need = 2 * in_tile + concat + lhs + accf32 + 2 * out_tile + 2 * wts
    vmem_limit = int(min(max(int(1.5 * need), 16 << 20), (3 * vmem_cap) // 4))

    cost = pl.CostEstimate(
        flops=int(2 * B * H_pad * Wp * Cp * Cp * 9),
        transcendentals=0,
        bytes_accessed=int(x_arg.size * in_item + w3.size * in_item
                           + B * H_pad * Wp * Cp * out_item))

    return pl.pallas_call(
        conv3x3_kernel,
        out_shape=jax.ShapeDtypeStruct((B, H_pad, Wp, Cp), out_dtype),
        grid_spec=pltpu.PrefetchScalarGridSpec(
            num_scalar_prefetch=0,
            grid=(B, nS),
            in_specs=[
                in_spec_x,
                # Constant index_map -> weights are DMA'd once and reused.
                pl.BlockSpec((3, 3 * Cp, Cp), lambda b, s: (0, 0, 0)),
            ],
            out_specs=pl.BlockSpec((None, TH, Wp, Cp), lambda b, s: (b, s, 0, 0)),
        ),
        compiler_params=pltpu.CompilerParams(
            dimension_semantics=("parallel", "parallel"),
            vmem_limit_bytes=vmem_limit),
        cost_estimate=cost,
    )(x_arg, w3)


@partial(jax.jit, static_argnames=("factor", "compute_dtype", "halo_mode"))
def upsample_forward(x_nchw, weight_oihw, factor,
                     compute_dtype=jnp.bfloat16, halo_mode="element"):
    """x_nchw: (B, n_feat, H, W); weight_oihw: (n_feat, n_feat, 3, 3) PyTorch layout."""
    B, C, H, W = x_nchw.shape
    assert C % factor == 0, "n_feat must be divisible by the upscale factor"
    out_dtype = x_nchw.dtype
    compute_dtype = jnp.dtype(compute_dtype)

    Cp = _round_up(C, 128)                       # lane-dense channels (unmasked vst)
    in_item = compute_dtype.itemsize
    out_item = jnp.dtype(out_dtype).itemsize
    sub = 8 * max(1, 4 // in_item)               # sublane tile: 8 (f32) / 16 (bf16)
    Wp = _round_up(W, sub)                       # free (TH, Wp) -> M merge in-kernel

    vmem_cap = _vmem_capacity_bytes()
    TH, nS = _plan_strip(B, H, Wp, Cp, in_item, out_item, vmem_cap)
    H_pad = nS * TH

    # NCHW -> NHWC fused with the conv halo pad, strip-rounding pad, W pad and
    # channel pad: a single staging pass under jit.
    x_nhwc = jnp.transpose(x_nchw, (0, 2, 3, 1)).astype(compute_dtype)
    x_p = jnp.pad(x_nhwc, ((0, 0), (1, 1 + H_pad - H), (1, 1 + Wp - W), (0, Cp - C)))

    # (O, I, ky, kx) -> (ky, kx, ci, co), zero-pad channels, fold (kx, ci) -> K.
    w = jnp.transpose(weight_oihw, (2, 3, 1, 0))
    w = jnp.pad(w, ((0, 0), (0, 0), (0, Cp - C), (0, Cp - C))).astype(compute_dtype)
    w3 = w.reshape(3, 3 * Cp, Cp)

    if halo_mode == "element":
        # Zero-copy halo: element-offset window s*TH of length TH+2 along H.
        x_arg = x_p
        in_spec_x = pl.BlockSpec((None, pl.Element(TH + 2), Wp + 2, Cp),
                                 lambda b, s: (b, s * TH, 0, 0))
    else:
        # Fallback: materialize overlapping haloed strips in HBM (extra pass).
        if nS > 1:
            row_idx = (jnp.arange(nS)[:, None] * TH
                       + jnp.arange(TH + 2)[None, :]).reshape(-1)
            x_arg = jnp.take(x_p, row_idx, axis=1).reshape(B, nS, TH + 2, Wp + 2, Cp)
        else:
            x_arg = x_p[:, None]
        in_spec_x = pl.BlockSpec((None, None, TH + 2, Wp + 2, Cp),
                                 lambda b, s: (b, s, 0, 0, 0))

    y = _conv3x3_call(x_arg, w3, in_spec_x, B, nS, TH, Wp, Cp,
                      out_dtype, compute_dtype, vmem_cap)    # (B, H_pad, Wp, Cp)
    y = y[:, :H, :W, :C]                         # drop strip / width / channel padding

    # PixelShuffle1D in NHWC: out[b, h, ws*f + r, cl] = y[b, h, ws, r*(C//f) + cl]
    # == a pure reshape of the trailing (W, C) dims; no extra HBM pass.
    y = y.reshape(B, H, W * factor, C // factor)
    return jnp.transpose(y, (0, 3, 1, 2))        # back to the module's NCHW


def pixel_shuffle_1d_nchw(y_nchw, factor):
    # Matches PixelShuffle1D.forward exactly (used for the reference only).
    B, C, H, W = y_nchw.shape
    Cl = C // factor
    y = y_nchw.reshape(B, factor, Cl, H, W)
    y = jnp.transpose(y, (0, 2, 3, 4, 1))
    return y.reshape(B, Cl, H, factor * W)


if __name__ == "__main__":
    key = jax.random.PRNGKey(0)
    k_x, k_w = jax.random.split(key)

    B, n_feat, H, W = 2, 4, 16, 16
    factor = 2

    x = jax.random.normal(k_x, (B, n_feat, H, W), dtype=jnp.float32)
    fan_in = n_feat * 3 * 3
    bound = 1.0 / (fan_in ** 0.5)
    weight = jax.random.uniform(k_w, (n_feat, n_feat, 3, 3),
                                minval=-bound, maxval=bound, dtype=jnp.float32)

    # Plain-JAX reference of the same math (3x3 "SAME" conv, no bias, then
    # 1-D pixel shuffle along W).
    ref_conv = jax.lax.conv_general_dilated(
        x, weight, window_strides=(1, 1), padding="SAME",
        dimension_numbers=("NCHW", "OIHW", "NCHW"))
    ref = pixel_shuffle_1d_nchw(ref_conv, factor)

    # Prefer the zero-copy pl.Element halo windows; fall back to HBM-staged
    # strips if this Mosaic build rejects element-offset block windows.
    halo_mode = "element"
    try:
        out_bf16 = jax.block_until_ready(
            upsample_forward(x, weight, factor, halo_mode=halo_mode))
    except Exception:
        halo_mode = "staged"
        out_bf16 = jax.block_until_ready(
            upsample_forward(x, weight, factor, halo_mode=halo_mode))

    assert out_bf16.shape == (B, n_feat // factor, H, factor * W)
    assert jnp.allclose(out_bf16, ref, atol=3e-2, rtol=3e-2)

    # Exact-precision path (f32 compute + f32 accumulation).
    out_f32 = jax.block_until_ready(
        upsample_forward(x, weight, factor, compute_dtype=jnp.float32,
                         halo_mode=halo_mode))
    assert out_f32.shape == ref.shape
    assert jnp.allclose(out_f32, ref, atol=1e-4, rtol=1e-4)

    print("KERNEL_OK")
</pallas_src>

<mosaic_0001>
module attributes {stable_mosaic.version = 11 : i64} {
  func.func @conv3x3_kernel(%arg0: i32, %arg1: i32, %arg2: memref<1x1x10x18x128xbf16, #tpu.memory_space<vmem>>, %arg3: memref<3x384x128xbf16, #tpu.memory_space<vmem>>, %arg4: memref<1x8x16x128xf32, #tpu.memory_space<vmem>>) attributes {dimension_semantics = [#tpu.dimension_semantics<parallel>, #tpu.dimension_semantics<parallel>], iteration_bounds = array<i64: 2, 2>, scalar_prefetch = 0 : i64, scratch_operands = 0 : i64, tpu.core_type = #tpu.core_type<tc>, window_params = [{transform_indices = @transform_0, window_bounds = array<i64: 1, 1, 10, 18, 128>}, {pipeline_mode = #tpu.pipeline_mode<synchronous>, transform_indices = @transform_1, window_bounds = array<i64: 3, 384, 128>}, {transform_indices = @transform_2, window_bounds = array<i64: 1, 8, 16, 128>}]} {
    %c0 = arith.constant 0 : index
    %c0_0 = arith.constant 0 : index
    %c0_1 = arith.constant 0 : index
    %c0_2 = arith.constant 0 : index
    %c0_3 = arith.constant 0 : index
    %0 = vector.load %arg2[%c0, %c0_0, %c0_1, %c0_2, %c0_3] : memref<1x1x10x18x128xbf16, #tpu.memory_space<vmem>>, vector<1x1x10x16x128xbf16>
    %1 = vector.shape_cast %0 : vector<1x1x10x16x128xbf16> to vector<10x16x128xbf16>
    %c0_4 = arith.constant 0 : index
    %c0_5 = arith.constant 0 : index
    %c0_6 = arith.constant 0 : index
    %c1 = arith.constant 1 : index
    %c0_7 = arith.constant 0 : index
    %2 = vector.load %arg2[%c0_4, %c0_5, %c0_6, %c1, %c0_7] : memref<1x1x10x18x128xbf16, #tpu.memory_space<vmem>>, vector<1x1x10x16x128xbf16>
    %3 = vector.shape_cast %2 : vector<1x1x10x16x128xbf16> to vector<10x16x128xbf16>
    %c0_8 = arith.constant 0 : index
    %c0_9 = arith.constant 0 : index
    %c0_10 = arith.constant 0 : index
    %c2 = arith.constant 2 : index
    %c0_11 = arith.constant 0 : index
    %4 = vector.load %arg2[%c0_8, %c0_9, %c0_10, %c2, %c0_11] : memref<1x1x10x18x128xbf16, #tpu.memory_space<vmem>>, vector<1x1x10x16x128xbf16>
    %5 = vector.shape_cast %4 : vector<1x1x10x16x128xbf16> to vector<10x16x128xbf16>
    %6 = tpu.concatenate %1, %3, %5 in 2 : vector<10x16x128xbf16>, vector<10x16x128xbf16>, vector<10x16x128xbf16> -> vector<10x16x384xbf16>
    %7 = vector.extract_strided_slice %6 {offsets = [0, 0, 0], sizes = [8, 16, 384], strides = [1, 1, 1]} : vector<10x16x384xbf16> to vector<8x16x384xbf16>
    %8 = vector.shape_cast %7 : vector<8x16x384xbf16> to vector<128x384xbf16>
    %c0_12 = arith.constant 0 : index
    %c0_13 = arith.constant 0 : index
    %c0_14 = arith.constant 0 : index
    %9 = vector.load %arg3[%c0_12, %c0_13, %c0_14] : memref<3x384x128xbf16, #tpu.memory_space<vmem>>, vector<1x384x128xbf16>
    %10 = vector.shape_cast %9 : vector<1x384x128xbf16> to vector<384x128xbf16>
    %cst = arith.constant dense<0.000000e+00> : vector<128x128xf32>
    %11 = tpu.matmul %8, %10, %cst {dimension_numbers = #tpu.dot_dimension_numbers<[1], [0], [0], [1], [0, 0, 1, 1], [], []>} : vector<128x384xbf16>, vector<384x128xbf16>, vector<128x128xf32> -> vector<128x128xf32>
    %12 = vector.extract_strided_slice %6 {offsets = [1, 0, 0], sizes = [8, 16, 384], strides = [1, 1, 1]} : vector<10x16x384xbf16> to vector<8x16x384xbf16>
    %13 = vector.shape_cast %12 : vector<8x16x384xbf16> to vector<128x384xbf16>
    %c1_15 = arith.constant 1 : index
    %c0_16 = arith.constant 0 : index
    %c0_17 = arith.constant 0 : index
    %14 = vector.load %arg3[%c1_15, %c0_16, %c0_17] : memref<3x384x128xbf16, #tpu.memory_space<vmem>>, vector<1x384x128xbf16>
    %15 = vector.shape_cast %14 : vector<1x384x128xbf16> to vector<384x128xbf16>
    %cst_18 = arith.constant dense<0.000000e+00> : vector<128x128xf32>
    %16 = tpu.matmul %13, %15, %cst_18 {dimension_numbers = #tpu.dot_dimension_numbers<[1], [0], [0], [1], [0, 0, 1, 1], [], []>} : vector<128x384xbf16>, vector<384x128xbf16>, vector<128x128xf32> -> vector<128x128xf32>
    %17 = arith.addf %11, %16 : vector<128x128xf32>
    %18 = vector.extract_strided_slice %6 {offsets = [2, 0, 0], sizes = [8, 16, 384], strides = [1, 1, 1]} : vector<10x16x384xbf16> to vector<8x16x384xbf16>
    %19 = vector.shape_cast %18 : vector<8x16x384xbf16> to vector<128x384xbf16>
    %c2_19 = arith.constant 2 : index
    %c0_20 = arith.constant 0 : index
    %c0_21 = arith.constant 0 : index
    %20 = vector.load %arg3[%c2_19, %c0_20, %c0_21] : memref<3x384x128xbf16, #tpu.memory_space<vmem>>, vector<1x384x128xbf16>
    %21 = vector.shape_cast %20 : vector<1x384x128xbf16> to vector<384x128xbf16>
    %cst_22 = arith.constant dense<0.000000e+00> : vector<128x128xf32>
    %22 = tpu.matmul %19, %21, %cst_22 {dimension_numbers = #tpu.dot_dimension_numbers<[1], [0], [0], [1], [0, 0, 1, 1], [], []>} : vector<128x384xbf16>, vector<384x128xbf16>, vector<128x128xf32> -> vector<128x128xf32>
    %23 = arith.addf %17, %22 : vector<128x128xf32>
    %24 = vector.shape_cast %23 : vector<128x128xf32> to vector<8x16x128xf32>
    %c0_23 = arith.constant 0 : index
    %c0_24 = arith.constant 0 : index
    %c0_25 = arith.constant 0 : index
    %c0_26 = arith.constant 0 : index
    %25 = vector.load %arg4[%c0_23, %c0_24, %c0_25, %c0_26] : memref<1x8x16x128xf32, #tpu.memory_space<vmem>>, vector<1x8x16x128xf32>
    %26 = vector.shape_cast %25 : vector<1x8x16x128xf32> to vector<8x16x128xf32>
    %27 = vector.shape_cast %24 : vector<8x16x128xf32> to vector<1x8x16x128xf32>
    tpu.vector_store %arg4[%c0_23, %c0_24, %c0_25, %c0_26], %27 {strides = array<i32>} : memref<1x8x16x128xf32, #tpu.memory_space<vmem>>, vector<1x8x16x128xf32>,
    return
  }
  func.func @transform_0(%arg0: i32, %arg1: i32) -> (i32, i32, i32, i32, i32) {
    %c0_i32 = arith.constant 0 : i32
    %c0_i32_0 = arith.constant 0 : i32
    %c0_i32_1 = arith.constant 0 : i32
    %c0_i32_2 = arith.constant 0 : i32
    return %arg0, %arg1, %c0_i32, %c0_i32_0, %c0_i32_1 : i32, i32, i32, i32, i32
  }
  func.func @transform_1(%arg0: i32, %arg1: i32) -> (i32, i32, i32) {
    %c0_i32 = arith.constant 0 : i32
    %c0_i32_0 = arith.constant 0 : i32
    %c0_i32_1 = arith.constant 0 : i32
    %c0_i32_2 = arith.constant 0 : i32
    return %c0_i32, %c0_i32_0, %c0_i32_1 : i32, i32, i32
  }
  func.func @transform_2(%arg0: i32, %arg1: i32) -> (i32, i32, i32, i32) {
    %c0_i32 = arith.constant 0 : i32
    %c0_i32_0 = arith.constant 0 : i32
    %c0_i32_1 = arith.constant 0 : i32
    return %arg0, %arg1, %c0_i32, %c0_i32_0 : i32, i32, i32, i32
  }
}

</mosaic_0001>

<bundles_post_ra>
// kernel: upsample_forward.1
= control target key start
LH: loop header
LB: loop body
LE: loop exit
PB: predicated region body
PF: predicated region fallthrough
CT: control target
= control target key end

     0   :  { %s2648_s9 = smov 0   ;;  %s2650_s10 = smov 0   ;;  %s3251_s0 = inlined_call_operand.vmem [shape: bf16[2,2,10,18,128], index: 0, kind: input, shape index: {}]   ;;  %s3252_s1 = inlined_call_operand.vmem [shape: bf16[3,384,128], index: 1, kind: input, shape index: {}]   ;;  %s3253_s2 = inlined_call_operand.vmem [shape: f32[2,16,16,128], index: 2, kind: output, shape index: {}]  }
   0x1   :  { %s2652_s11 = smov 0   ;;  %s2654_s12 = smov 0  }
   0x2   :  { %s2656_s13 = smov 0  }
   0x3 LB: > { %s21_s14 = sadd.s32 1, %s2623_s11  ;;  %s24_s15 = sadd.s32 1, %s2627_s12  ;;  %s2631_s13 = sphi %s2656_s13, %s12_s13   ;;  %s2627_s12 = sphi %s2654_s12, %s3257_s12   ;;  %s2623_s11 = sphi %s2652_s11, %s3256_s11   ;;  %s2619_s10 = sphi %s2650_s10, %s3255_s10   ;;  %s2615_s9 = sphi %s2648_s9, %s3254_s9  }
   0x4   : > { %p22_p0 = scmp.ge.s32.totalorder %s21_s14, 2  ;;  %p1811_p1 = scmp.ge.s32.totalorder %s2631_s13, 1 }
   0x5   : > { %p132_p2 = scmp.lt.s32.totalorder %s2631_s13, 5 }
   0x6   : > { %s3259_s14 = smov (%p22_p0, %s21_s14), 0  ;;  %s3261_s15 = smov (!%p22_p0, %s24_s15), %s2627_s12 }
   0x7   : > { %p133_p3 = pnand %p1811_p1, %p132_p2  ;;  %p26_p4 = scmp.ge.s32.totalorder %s3261_s15, 2 }
   0x8   : > { %v2491_v0 = vld [vmem:[%s3252_s1 + $0x100] sm:$0xff] (!%p133_p3)   ;;  %p163_p5 = scmp.lt.s32.totalorder (!%p133_p3), %s2619_s10, 1  ;;  %v2494_v3 = vld [vmem:[%s3252_s1 + $0x108] sm:$0xff] (!%p133_p3)   ;;  %p165_p6 = scmp.lt.s32.totalorder (!%p133_p3), %s2615_s9, 1  ;;  %v2497_v6 = vld [vmem:[%s3252_s1 + $0x110] sm:$0xff] (!%p133_p3)   ;;  %vm475_vm0 = vcmask (!%p133_p3), 1046528  }
   0x9   : > { %s3263_s15 = smov (%p26_p4, %s3261_s15), 0  ;;  %136 = sbr.rel (%p133_p3) target bundleno = 397 (0x18d), region = 28 }
   0xa   : > { %v2492_v1 = vld [vmem:[%s3252_s1 + $0x140] sm:$0xff] (!%p133_p3)   ;;  %2017 = vmatprep.subr.bf16.mxu0 (!%p133_p3), %v2491_v0  ;;  %v2495_v4 = vld [vmem:[%s3252_s1 + $0x148] sm:$0xff] (!%p133_p3)   ;;  %v2498_v7 = vld [vmem:[%s3252_s1 + $0x150] sm:$0xff] (!%p133_p3)   ;;  %vm314_vm1 = vsmask.f32 (!%p133_p3), 7424 }
   0xb   : > { %v2493_v2 = vld [vmem:[%s3252_s1 + $0xc0] sm:$0xff] (!%p133_p3)   ;;  %2257 = vmatprep.subr.bf16.mxu1 (!%p133_p3), %v2492_v1  ;;  %v2496_v5 = vld [vmem:[%s3252_s1 + $0xc8] sm:$0xff] (!%p133_p3)   ;;  %v2499_v8 = vld [vmem:[%s3252_s1 + $0xd0] sm:$0xff] (!%p133_p3)  }
   0xc   : > { %2018 = vmatpush3.bf16.msra.mxu0 (!%p133_p3), %v2493_v2  ;;  %2258 = vmatpush3.bf16.msra.mxu1 (!%p133_p3), %v2492_v1  ;;  %v2500_v9 = vld [vmem:[%s3252_s1 + $0x118] sm:$0xff] (!%p133_p3)   ;;  %v2503_v12 = vld [vmem:[%s3252_s1 + $0x120] sm:$0xff] (!%p133_p3)   ;;  %v2506_v15 = vld [vmem:[%s3252_s1 + $0x128] sm:$0xff] (!%p133_p3)  }
   0xd   : > { %2019 = vmatprep.subr.bf16.mxu0 (!%p133_p3), %v2494_v3  ;;  %2259 = vmatprep.subr.bf16.mxu1 (!%p133_p3), %v2495_v4  ;;  %v2501_v10 = vld [vmem:[%s3252_s1 + $0x158] sm:$0xff] (!%p133_p3)   ;;  %v2504_v13 = vld [vmem:[%s3252_s1 + $0x160] sm:$0xff] (!%p133_p3)   ;;  %v2507_v16 = vld [vmem:[%s3252_s1 + $0x168] sm:$0xff] (!%p133_p3)  }
   0xe   : > { %v2502_v11 = vld [vmem:[%s3252_s1 + $0xd8] sm:$0xff] (!%p133_p3)   ;;  %v2505_v14 = vld [vmem:[%s3252_s1 + $0xe0] sm:$0xff] (!%p133_p3)   ;;  %v2508_v17 = vld [vmem:[%s3252_s1 + $0xe8] sm:$0xff] (!%p133_p3)  }
   0xf   : > { %v2509_v18 = vld [vmem:[%s3252_s1 + $0x130] sm:$0xff] (!%p133_p3)   ;;  %v2512_v21 = vld [vmem:[%s3252_s1 + $0x138] sm:$0xff] (!%p133_p3)   ;;  %v2521_v35 = vld [vmem:[%s3252_s1 + $0x40] sm:$0xff] (!%p133_p3)  }
  0x10   : > { %s3265_s10 = smov (!%p163_p5, %s2619_s10), 1  ;;  %2020 = vmatpush3.bf16.msra.mxu0 %v2496_v5  ;;  %2260 = vmatpush3.bf16.msra.mxu1 %v2495_v4  ;;  %v2510_v19 = vld [vmem:[%s3252_s1 + $0x170] sm:$0xff]   ;;  %v2513_v24 = vld [vmem:[%s3252_s1 + $0x178] sm:$0xff]   ;;  %v2522_v43 = vld [vmem:[%s3252_s1 + $0x1c0] sm:$0xff]  }
  0x11   : > { %s166_s4 = scalar_select %p165_p6, %s2615_s9, 1  ;;  %2021 = vmatprep.subr.bf16.mxu0 %v2497_v6  ;;  %2261 = vmatprep.subr.bf16.mxu1 %v2498_v7  ;;  %v2511_v20 = vld [vmem:[%s3252_s1 + $0xf0] sm:$0xff]   ;;  %v2514_v27 = vld [vmem:[%s3252_s1 + $0xf8] sm:$0xff]   ;;  %v2523_v46 = vld [vmem:[%s3252_s1] sm:$0xff]  }
  0x12   : > { %s2450_s18 = smul.u32 60, %s3265_s10  ;;  %v2524_v47 = vld [vmem:[%s3252_s1 + $0x180] sm:$0xff]   ;;  %v2525_v51 = vld [vmem:[%s3252_s1 + $0x48] sm:$0xff]   ;;  %v2533_v2 = vld [vmem:[%s3252_s1 + $0x50] sm:$0xff]   ;;  %s1815_s26 = sshll.u32 %s3265_s10, 5 }
  0x13   : > { %s2449_s21 = smul.u32 30, %s166_s4  ;;  %v2526_v57 = vld [vmem:[%s3252_s1 + $0x8] sm:$0xff]  }
  0x14   : > { %2022 = vmatpush3.bf16.msra.mxu0 %v2499_v8  ;;  %2262 = vmatpush3.bf16.msra.mxu1 %v2498_v7 }
  0x15   : > { %2023 = vmatprep.subr.bf16.mxu0 %v2500_v9  ;;  %2263 = vmatprep.subr.bf16.mxu1 %v2501_v10  ;;  %s169_s28 = sadd.s32 %s2450_s18, %s2449_s21 }
  0x16   : > { %s1812_s5 = sshll.u32 %s169_s28, 2 }
  0x17   : > { %s2752_s21 = scalar_lea.vmem %s3251_s0, %s1812_s5 }
  0x18   : > { %2024 = vmatpush3.bf16.msra.mxu0 %v2502_v11  ;;  %2264 = vmatpush3.bf16.msra.mxu1 %v2501_v10  ;;  %v186_v22 = vld [vmem:[%s2752_s21 + $0xc] sm:$0xf]  ;;  %v187_v23 = vld [vmem:[%s2752_s21 + $0x10] sm:$0xf]  ;;  %v188_v29 = vld [vmem:[%s2752_s21 + $0x18] sm:$0xf] }
  0x19   : > { %2025 = vmatprep.subr.bf16.mxu0 %v2503_v12  ;;  %2265 = vmatprep.subr.bf16.mxu1 %v2504_v13  ;;  %v2765_v25 = vcombine.low %v186_v22, %v187_v23  ;;  %v2516_v26 = vld [vmem:[%s2752_s21 + $0x14] ss:$0 sps:$4 sm:$0x11]   ;;  %v215_v28 = vld [vmem:[%s2752_s21 + $0xc] sm:$0xe]  ;;  %v2538_v22 = vld [vmem:[%s3252_s1 + $0x18] sm:$0xff]  }
  0x1a   : > { %v189_v30 = vld [vmem:[%s2752_s21 + $0x1c] sm:$0xf]  ;;  %v335_v33 = vshll.u32 %v2516_v26, 16  ;;  %v1838_v34 = vcombine.low %v215_v28, %v187_v23  ;;  %v480_v36 = vrot.slane %v2516_v26, 1  ;;  %v216_v37 = vld [vmem:[%s2752_s21 + $0x18] sm:$0xe] }
  0x1b   : > { %v328_v31 = vshrl.u32 %v2765_v25, 16  ;;  %v330_v32 = vshll.u32 %v2765_v25, 16  ;;  %v2519_v38 = vld [vmem:[%s2752_s21 + $0x20] ss:$0 sps:$4 sm:$0x11]   ;;  %v1839_v42 = vcombine.low %v216_v37, %v189_v30  ;;  %v2784_v44 = vcombine.low %v188_v29, %v189_v30  ;;  %v2534_v10 = vld [vmem:[%s3252_s1 + $0x1c8] sm:$0xff]  }
  0x1c   : > { %2026 = vmatpush3.bf16.msra.mxu0 %v2505_v14  ;;  %2266 = vmatpush3.bf16.msra.mxu1 %v2504_v13  ;;  %v337_v40 = vrot.slane %v335_v33, 1  ;;  %v479_v41 = vrot.slane %v1838_v34, 1  ;;  %v483_v45 = vrot.slane %v2519_v38, 1  ;;  %v347_v56 = vshll.u32 %v2519_v38, 16  ;;  %v191_v58 = vld [vmem:[%s2752_s21 + $0x28] sm:$0xf] }
  0x1d   : > { %2027 = vmatprep.subr.bf16.mxu0 %v2506_v15  ;;  %2267 = vmatprep.subr.bf16.mxu1 %v2507_v16  ;;  %v332_v39 = vrot.slane %v330_v32, 1  ;;  %v482_v50 = vrot.slane %v1839_v42, 1  ;;  %v340_v54 = vshrl.u32 %v2784_v44, 16  ;;  %v342_v55 = vshll.u32 %v2784_v44, 16  ;;  %v190_v61 = vld [vmem:[%s2752_s21 + $0x24] sm:$0xf] }
  0x1e   : > { %v2793_v49 = vsel %vm475_vm0, %v479_v41, %v480_v36  ;;  %v349_v60 = vrot.slane %v347_v56, 1  ;;  %v217_v62 = vld [vmem:[%s2752_s21 + $0x24] sm:$0xe]  ;;  %v2528_v63 = vld [vmem:[%s2752_s21 + $0x2c] ss:$0 sps:$4 sm:$0x11]   ;;  %v2822_v5 = vcombine.low %v190_v61, %v191_v58 }
  0x1f   : > { %v333_v48 = vor.u32 %v332_v39, %v328_v31  ;;  %2273 = vmatprep.mubr.bf16.mxu1 %v2793_v49  ;;  %v2803_v53 = vsel %vm475_vm0, %v482_v50, %v483_v45  ;;  %v344_v59 = vrot.slane %v342_v55, 1  ;;  %v1840_v0 = vcombine.low %v217_v62, %v191_v58  ;;  %v193_v1 = vld [vmem:[%s2752_s21 + $0x34] sm:$0xf]  ;;  %v218_v4 = vld [vmem:[%s2752_s21 + $0x30] sm:$0xe]  ;;  %v2545_v28 = vld [vmem:[%s3252_s1 + $0x60] sm:$0xff]  }
  0x20   : > { %2028 = vmatpush3.bf16.msra.mxu0 %v2508_v17  ;;  %2268 = vmatpush3.bf16.msra.mxu1 %v2507_v16  ;;  %v486_v7 = vrot.slane %v2528_v63, 1  ;;  %v2825_v8 = vld [vmem:[%s2752_s21 + $0x38] ss:$0 sps:$4 sm:$0x11]   ;;  %v1841_v9 = vcombine.low %v218_v4, %v193_v1  ;;  %v2535_v15 = vld [vmem:[%s3252_s1 + $0x10] sm:$0xff]   ;;  %v352_v16 = vshrl.u32 %v2822_v5, 16 }
  0x21   : > { %2029 = vmatprep.subr.bf16.mxu0 %v2509_v18  ;;  %2269 = vmatprep.subr.bf16.mxu1 %v2510_v19  ;;  %v2799_v52 = vsel %vm314_vm1, %v333_v48, %v337_v40  ;;  %v345_v3 = vor.u32 %v344_v59, %v340_v54  ;;  %v485_v6 = vrot.slane %v1840_v0, 1  ;;  %v489_v14 = vrot.slane %v2825_v8, 1  ;;  %v2536_v18 = vld [vmem:[%s3252_s1 + $0x188] sm:$0xff]   ;;  %v192_v29 = vld [vmem:[%s2752_s21 + $0x30] sm:$0xf]  ;;  %v2547_v40 = vld [vmem:[%s3252_s1 + $0x20] sm:$0xff]  }
  0x22   : > { %789 = vmatprep.mubr.bf16.mxu0 %v2799_v52  ;;  %v488_v13 = vrot.slane %v1841_v9, 1  ;;  %v2865_v31 = vld [vmem:[%s2752_s21 + $0x44] ss:$0 sps:$4 sm:$0x11]   ;;  %v2546_v33 = vld [vmem:[%s3252_s1 + $0x1d0] sm:$0xff]   ;;  %v2886_v42 = vcombine.low %v192_v29, %v193_v1  ;;  %v2549_v48 = vld [vmem:[%s3252_s1 + $0x68] sm:$0xff]  }
  0x23   : > { %v2831_v11 = vsel %vm314_vm1, %v345_v3, %v349_v60  ;;  %v2835_v12 = vsel %vm475_vm0, %v485_v6, %v486_v7  ;;  %v2871_v34 = vld [vmem:[%s2752_s21 + $0x4c] sm:$0xf]  ;;  %v492_v38 = vrot.slane %v2865_v31, 1  ;;  %v2879_v39 = vld [vmem:[%s2752_s21 + $0x50] ss:$0 sps:$4 sm:$0x11]  }
  0x24   : > { %2030 = vmatpush3.bf16.msra.mxu0 %v2511_v20  ;;  %2270 = vmatpush3.bf16.msra.mxu1 %v2510_v19  ;;  %v2845_v17 = vsel %vm475_vm0, %v488_v13, %v489_v14  ;;  %v354_v19 = vshll.u32 %v2822_v5, 16  ;;  %v2537_v20 = vld [vmem:[%s3252_s1 + $0x58] sm:$0xff]   ;;  %v495_v45 = vrot.slane %v2879_v39, 1  ;;  %v364_v54 = vshrl.u32 %v2886_v42, 16  ;;  %v221_v59 = vld [vmem:[%s2752_s21 + $0x54] sm:$0xe] }
  0x25   : > { %2031 = vmatprep.subr.bf16.mxu0 %v2512_v21  ;;  %2271 = vmatprep.subr.bf16.mxu1 %v2513_v24  ;;  %v359_v21 = vshll.u32 %v2528_v63, 16  ;;  %v366_v55 = vshll.u32 %v2886_v42, 16  ;;  %v371_v56 = vshll.u32 %v2825_v8, 16  ;;  %v194_v58 = vld [vmem:[%s2752_s21 + $0x3c] sm:$0xf]  ;;  %v2557_v0 = vld [vmem:[%s3252_s1 + $0x70] sm:$0xff]  }
  0x26   : > { %v356_v23 = vrot.slane %v354_v19, 1  ;;  %v2914_v62 = vld [vmem:[%s2752_s21 + $0x5c] ss:$0 sps:$4 sm:$0x11]   ;;  %v201_v1 = vld [vmem:[%s2752_s21 + $0x64] sm:$0xf] }
  0x27   : > { %v361_v26 = vrot.slane %v359_v21, 1  ;;  %v368_v60 = vrot.slane %v366_v55, 1  ;;  %v373_v61 = vrot.slane %v371_v56, 1  ;;  %v498_v6 = vrot.slane %v2914_v62, 1  ;;  %v2558_v8 = vld [vmem:[%s3252_s1 + $0x1d8] sm:$0xff]  }
  0x28   : > { %2032 = vmatpush3.bf16.msra.mxu0 %v2514_v27  ;;  %2272 = vmatpush3.bf16.msra.mxu1 %v2513_v24  ;;  %v195_v24 = vld [vmem:[%s2752_s21 + $0x40] sm:$0xf]  ;;  %v219_v27 = vld [vmem:[%s2752_s21 + $0x3c] sm:$0xe]  ;;  %v357_v30 = vor.u32 %v356_v23, %v352_v16  ;;  %v196_v13 = vld [vmem:[%s2752_s21 + $0x48] sm:$0xf] }
  0x29   : > { %2097 = vmatprep.subr.bf16.mxu1 %v2521_v35  ;;  %2177 = vmatprep.subr.bf16.mxu0 %v2522_v43  ;;  %v1842_v32 = vcombine.low %v219_v27, %v195_v24  ;;  %v220_v35 = vld [vmem:[%s2752_s21 + $0x48] sm:$0xe]  ;;  %v369_v3 = vor.u32 %v368_v60, %v364_v54  ;;  %v2923_v7 = vld [vmem:[%s2752_s21 + $0x68] ss:$0 sps:$4 sm:$0x11]   ;;  %v395_v56 = vshll.u32 %v2879_v39, 16 }
  0x2a   : > { %v2875_v36 = vsel %vm314_vm1, %v357_v30, %v361_v26  ;;  %v1843_v41 = vcombine.low %v220_v35, %v2871_v34  ;;  %v501_v16 = vrot.slane %v2923_v7, 1  ;;  %v2562_v26 = vld [vmem:[%s3252_s1 + $0x38] sm:$0xff]   ;;  %v184_v29 = vld [vmem:[%s2752_s21] sm:$0xf]  ;;  %v2569_v39 = vld [vmem:[%s3252_s1 + $0x1e8] sm:$0xff]  }
  0x2b   : > { %790 = vmatmul.mubr.bf16.vlgmr.msra.gmra.mrb[0].mxu0 %v2765_v25  ;;  %2274 = vmatmul.mubr.bf16.vlgmr.msra.gmra.mrb[0].mxu1 %v2803_v53  ;;  %v491_v37 = vrot.slane %v1842_v32, 1  ;;  %v2932_v14 = vsel %vm314_vm1, %v369_v3, %v373_v61  ;;  %v2565_v30 = vld [vmem:[%s3252_s1 + $0x80] sm:$0xff]   ;;  %v2966_v32 = vcombine.low %v196_v13, %v2871_v34 }
  0x2c   : > { %2098 = vmatpush3.bf16.msra.mxu1 %v2523_v46  ;;  %2178 = vmatpush3.bf16.msra.mxu0 %v2524_v47  ;;  %v2548_v46 = vld [vmem:[%s3252_s1 + $0x190] sm:$0xff]   ;;  %v494_v47 = vrot.slane %v1843_v41, 1  ;;  %v200_v41 = vld [vmem:[%s2752_s21 + $0x60] sm:$0xf] }
  0x2d   : > { %2099 = vmatprep.subr.bf16.mxu1 %v2525_v51  ;;  %797 = vmatprep.mubr.bf16.mxu0 %v2831_v11  ;;  %v2889_v43 = vsel %vm475_vm0, %v491_v37, %v492_v38  ;;  %v2550_v51 = vld [vmem:[%s3252_s1 + $0x28] sm:$0xff]   ;;  %v388_v54 = vshrl.u32 %v2966_v32, 16  ;;  %v390_v55 = vshll.u32 %v2966_v32, 16 }
  0x2e   : > { %2277 = vmatprep.mubr.bf16.mxu1 %v2835_v12  ;;  %2179 = vmatprep.subr.bf16.mxu0 %v2534_v10  ;;  %v2901_v50 = vsel %vm475_vm0, %v494_v47, %v495_v45  ;;  %v2928_v10 = vcombine.low %v194_v58, %v195_v24  ;;  %v198_v24 = vld [vmem:[%s2752_s21 + $0x54] sm:$0xf] }
  0x2f   : > { %v392_v61 = vrot.slane %v390_v55, 1  ;;  %v202_v55 = vld [vmem:[%s2752_s21 + $0x6c] sm:$0xf] }
  0x30   : > { %2100 = vmatpush3.bf16.msra.mxu1 %v2526_v57  ;;  %2180 = vmatpush3.bf16.msra.mxu0 %v2536_v18  ;;  %v199_v57 = vld [vmem:[%s2752_s21 + $0x58] sm:$0xf]  ;;  %v2559_v18 = vld [vmem:[%s3252_s1 + $0x30] sm:$0xff]   ;;  %v376_v23 = vshrl.u32 %v2928_v10, 16  ;;  %v378_v27 = vshll.u32 %v2928_v10, 16 }
  0x31   : > { %2101 = vmatprep.subr.bf16.mxu1 %v2533_v2  ;;  %2181 = vmatprep.subr.bf16.mxu0 %v2546_v33  ;;  %v1844_v63 = vcombine.low %v221_v59, %v199_v57  ;;  %v222_v2 = vld [vmem:[%s2752_s21 + $0x60] sm:$0xe]  ;;  %v2969_v33 = vld [vmem:[%s2752_s21 + $0x4] sm:$0xf]  ;;  %v393_v3 = vor.u32 %v392_v61, %v388_v54 }
  0x32   : > { %v1845_v9 = vcombine.low %v222_v2, %v201_v1  ;;  %v380_v35 = vrot.slane %v378_v27, 1  ;;  %v1817_v38 = vcombine.low %v184_v29, %v2969_v33  ;;  %v2568_v2 = vld [vmem:[%s3252_s1 + $0x88] sm:$0xff]   ;;  %v419_v27 = vshll.u32 %v2923_v7, 16  ;;  %v2576_v29 = vld [vmem:[%s3252_s1 + $0x1b8] sm:$0xff]  }
  0x33   : > { %798 = vmatmul.mubr.bf16.gmra.mrb[4].mxu0 %v2784_v44  ;;  %2278 = vmatmul.mubr.bf16.gmra.mrb[4].mxu1 %v2845_v17  ;;  %v497_v4 = vrot.slane %v1844_v63, 1  ;;  %v397_v63 = vrot.slane %v395_v56, 1  ;;  %v203_v56 = vld [vmem:[%s2752_s21 + $0x70] sm:$0xf] }
  0x34   : > { %2102 = vmatpush3.bf16.msra.mxu1 %v2535_v15  ;;  %805 = vmatprep.mubr.bf16.mxu0 %v2875_v36  ;;  %v500_v19 = vrot.slane %v1845_v9, 1  ;;  %v381_v45 = vor.u32 %v380_v35, %v376_v23  ;;  %v318_v34 = vshll.u32 %v1817_v38, 16 }
  0x35   : > { %2103 = vmatprep.subr.bf16.mxu1 %v2537_v20  ;;  %2281 = vmatprep.mubr.bf16.mxu1 %v2889_v43  ;;  %v2935_v15 = vsel %vm475_vm0, %v497_v4, %v498_v6  ;;  %v2560_v20 = vld [vmem:[%s3252_s1 + $0x198] sm:$0xff]   ;;  %v2570_v4 = vld [vmem:[%s3252_s1 + $0x1a8] sm:$0xff]   ;;  %v3009_v13 = vsel %vm314_vm1, %v393_v3, %v397_v63 }
  0x36   : > { %2182 = vmatpush3.bf16.msra.mxu0 %v2548_v46  ;;  %v2948_v21 = vsel %vm475_vm0, %v500_v19, %v501_v16  ;;  %v316_v46 = vshrl.u32 %v1817_v38, 16  ;;  %v320_v59 = vrot.slane %v318_v34, 1  ;;  %v2572_v19 = vld [vmem:[%s3252_s1 + $0x1f0] sm:$0xff]   ;;  %v2587_v34 = vld [vmem:[%s3252_s1 + $0x228] sm:$0xff]  }
  0x37   : > { %2183 = vmatprep.subr.bf16.mxu0 %v2558_v8  ;;  %v407_v8 = vshll.u32 %v2914_v62, 16  ;;  %v2571_v62 = vld [vmem:[%s3252_s1 + $0x90] sm:$0xff]  }
  0x38   : > { %2104 = vmatpush3.bf16.msra.mxu1 %v2538_v22  ;;  %v2561_v22 = vld [vmem:[%s3252_s1 + $0x78] sm:$0xff]  }
  0x39   : > { %2105 = vmatprep.subr.bf16.mxu1 %v2545_v28  ;;  %v383_v28 = vshll.u32 %v2865_v31, 16  ;;  %v2566_v31 = vld [vmem:[%s3252_s1 + $0x1e0] sm:$0xff]  }
  0x3a   : > { %2184 = vmatpush3.bf16.msra.mxu0 %v2560_v20  ;;  %v2573_v20 = vld [vmem:[%s3252_s1 + $0x1b0] sm:$0xff]  }
  0x3b   : > { %806 = vmatmul.mubr.bf16.gmra.mrb[8].mxu0 %v2822_v5  ;;  %2282 = vmatmul.mubr.bf16.gmra.mrb[8].mxu1 %v2901_v50  ;;  %v385_v37 = vrot.slane %v383_v28, 1  ;;  %v2575_v28 = vld [vmem:[%s3252_s1 + $0x1f8] sm:$0xff]  }
  0x3c   : > { %2106 = vmatpush3.bf16.msra.mxu1 %v2547_v40  ;;  %813 = vmatprep.mubr.bf16.mxu0 %v2932_v14  ;;  %v2973_v40 = vld [vmem:[%s2752_s21 + $0x8] ss:$0 sps:$4 sm:$0x11]  }
  0x3d   : > { %2107 = vmatprep.subr.bf16.mxu1 %v2549_v48  ;;  %2285 = vmatprep.mubr.bf16.mxu1 %v2935_v15  ;;  %v323_v47 = vshll.u32 %v2973_v40, 16  ;;  %v2567_v48 = vld [vmem:[%s3252_s1 + $0x1a0] sm:$0xff]   ;;  %v2989_v58 = vsel %vm314_vm1, %v381_v45, %v385_v37  ;;  %v2574_v37 = vld [vmem:[%s3252_s1 + $0x98] sm:$0xff]  }
  0x3e   : > { %2185 = vmatprep.subr.bf16.mxu0 %v2566_v31  ;;  %v2577_v31 = vld [vmem:[%s3252_s1 + $0xa0] sm:$0xff]   ;;  %v2583_v45 = vld [vmem:[%s3252_s1 + $0xb8] sm:$0xff]  }
  0x3f   : > { %v325_v60 = vrot.slane %v323_v47, 1  ;;  %2186 = vmatpush3.bf16.msra.mxu0 %v2567_v48  ;;  %v214_v47 = vld [vmem:[%s2752_s21] sm:$0xe] }
  0x40   : > { %2108 = vmatpush3.bf16.msra.mxu1 %v2550_v51  ;;  %v2983_v51 = vcombine.low %v198_v24, %v199_v57  ;;  %v321_v57 = vor.u32 %v320_v59, %v316_v46  ;;  %2187 = vmatprep.subr.bf16.mxu0 %v2569_v39  ;;  %v2580_v46 = vld [vmem:[%s3252_s1 + $0x208] sm:$0xff]  }
  0x41   : > { %2109 = vmatprep.subr.bf16.mxu1 %v2557_v0  ;;  %v2992_v0 = vcombine.low %v200_v41, %v201_v1  ;;  %v2581_v41 = vld [vmem:[%s3252_s1 + $0xb0] sm:$0xff]  }
  0x42   : > { %v400_v6 = vshrl.u32 %v2983_v51, 16  ;;  %v402_v1 = vshll.u32 %v2983_v51, 16  ;;  %v326_v9 = vsel %vm314_vm1, %v321_v57, %v325_v60 }
  0x43   : > { %814 = vmatmul.mubr.bf16.gmra.mrb[12].mxu0 %v2886_v42  ;;  %2286 = vmatmul.mubr.bf16.gmra.mrb[12].mxu1 %v2948_v21  ;;  %v414_v23 = vshll.u32 %v2992_v0, 16 }
  0x44   : > { %2110 = vmatpush3.bf16.msra.mxu1 %v2559_v18  ;;  %821 = vmatprep.mubr.bf16.mxu0 %v2989_v58  ;;  %v404_v16 = vrot.slane %v402_v1, 1  ;;  %v409_v18 = vrot.slane %v407_v8, 1 }
  0x45   : > { %2111 = vmatprep.subr.bf16.mxu1 %v2561_v22  ;;  %1127 = vmatprep.mubr.bf16.mxu1 %v326_v9  ;;  %v412_v22 = vshrl.u32 %v2992_v0, 16 }
  0x46   : > { %2188 = vmatpush3.bf16.msra.mxu0 %v2570_v4  ;;  %v405_v24 = vor.u32 %v404_v16, %v400_v6 }
  0x47   : > { %2189 = vmatprep.subr.bf16.mxu0 %v2572_v19 }
  0x48   : > { %2112 = vmatpush3.bf16.msra.mxu1 %v2562_v26  ;;  %v416_v26 = vrot.slane %v414_v23, 1  ;;  %v3032_v35 = vsel %vm314_vm1, %v405_v24, %v409_v18 }
  0x49   : > { %2289 = vmatprep.subr.bf16.mxu1 %v2565_v30 }
  0x4a   : > { %2190 = vmatpush3.bf16.msra.mxu0 %v2573_v20  ;;  %v417_v7 = vor.u32 %v416_v26, %v412_v22 }
  0x4b   : > { %822 = vmatmul.mubr.bf16.gmra.mrb[16].mxu0 %v2928_v10  ;;  %1128 = vmatmul.mubr.bf16.vlgmr.msra.gmra.mrb[16].mxu1 %v1817_v38 }
  0x4c   : > { %829 = vmatprep.mubr.bf16.mxu0 %v3009_v13  ;;  %2290 = vmatpush3.bf16.msra.mxu1 %v2565_v30  ;;  %v421_v30 = vrot.slane %v419_v27, 1 }
  0x4d   : > { %1135 = vmatprep.mubr.bf16.mxu1 %v2799_v52  ;;  %2291 = vmatprep.subr.bf16.mxu1 %v2568_v2  ;;  %v3039_v52 = vld [vmem:[%s3252_s1 + $0x200] sm:$0xff]  }
  0x4e   : > { %2191 = vmatprep.subr.bf16.mxu0 %v2575_v28  ;;  %v3048_v38 = vsel %vm314_vm1, %v417_v7, %v421_v30 }
  0x4f   : > { %2192 = vmatpush3.bf16.msra.mxu0 %v2576_v29 }
  0x50   : > { %2292 = vmatpush3.bf16.msra.mxu1 %v2568_v2  ;;  %2321 = vmatprep.subr.bf16.mxu0 %v3039_v52 }
  0x51   : > { %2293 = vmatprep.subr.bf16.mxu1 %v2571_v62 }
  0x53   : > { %830 = vmatmul.mubr.bf16.gmra.mrb[20].mxu0 %v2966_v32  ;;  %1136 = vmatmul.mubr.bf16.gmra.mrb[20].mxu1 %v2765_v25  ;;  %v2579_v25 = vld [vmem:[%s3252_s1 + $0xa8] sm:$0xff]  }
  0x54   : > { %837 = vmatprep.mubr.bf16.mxu0 %v3032_v35  ;;  %1143 = vmatprep.mubr.bf16.mxu1 %v2831_v11 }
  0x55   : > { %2294 = vmatpush3.bf16.msra.mxu1 %v2571_v62 }
  0x56   : > { %2295 = vmatprep.subr.bf16.mxu1 %v2574_v37 }
  0x59   : > { %2296 = vmatpush3.bf16.msra.mxu1 %v2574_v37 }
  0x5a   : > { %2297 = vmatprep.subr.bf16.mxu1 %v2577_v31 }
  0x5b   : > { %838 = vmatmul.mubr.bf16.gmra.mrb[24].mxu0 %v2983_v51  ;;  %1144 = vmatmul.mubr.bf16.gmra.mrb[24].mxu1 %v2784_v44 }
  0x5c   : > { %845 = vmatprep.mubr.bf16.mxu0 %v3048_v38  ;;  %1151 = vmatprep.mubr.bf16.mxu1 %v2875_v36 }
  0x5d   : > { %2298 = vmatpush3.bf16.msra.mxu1 %v2577_v31 }
  0x5e   : > { %2299 = vmatprep.subr.bf16.mxu1 %v2579_v25 }
  0x61   : > { %2300 = vmatpush3.bf16.msra.mxu1 %v2579_v25 }
  0x62   : > { %2301 = vmatprep.subr.bf16.mxu1 %v2581_v41 }
  0x63   : > { %846 = vmatmul.mubr.bf16.gmra.mrb[28].mxu0 %v2992_v0  ;;  %1152 = vmatmul.mubr.bf16.gmra.mrb[28].mxu1 %v2822_v5 }
  0x64   : > { %1514 = vmatprep.mubr.bf16.mxu0 %v2831_v11  ;;  %1159 = vmatprep.mubr.bf16.mxu1 %v2932_v14  ;;  %v2582_v11 = vld [vmem:[%s3252_s1 + $0x210] sm:$0xff]  }
  0x65   : > { %2302 = vmatpush3.bf16.msra.mxu1 %v2581_v41 }
  0x66   : > { %2303 = vmatprep.subr.bf16.mxu1 %v2583_v45 }
  0x69   : > { %2304 = vmatpush3.bf16.msra.mxu1 %v2583_v45 }
  0x6a   : > { %2353 = vmatprep.subr.bf16.mxu1 %v3039_v52 }
  0x6b   : > { %1515 = vmatmul.mubr.bf16.vlgmr.msra.gmra.mrb[32].mxu0 %v2784_v44  ;;  %1160 = vmatmul.mubr.bf16.gmra.mrb[32].mxu1 %v2886_v42  ;;  %v2584_v44 = vld [vmem:[%s3252_s1 + $0x218] sm:$0xff]  }
  0x6c   : > { %2322 = vmatpush3.bf16.msra.mxu0 %v3039_v52  ;;  %1522 = vmatprep.mubr.bf16.mxu0 %v2875_v36  ;;  %v2586_v36 = vld [vmem:[%s3252_s1 + $0x220] sm:$0xff]  }
  0x6d   : > { %2323 = vmatprep.subr.bf16.mxu0 %v2580_v46  ;;  %1167 = vmatprep.mubr.bf16.mxu1 %v2989_v58 }
  0x70   : > { %2324 = vmatpush3.bf16.msra.mxu0 %v2580_v46 }
  0x71   : > { %2325 = vmatprep.subr.bf16.mxu0 %v2582_v11 }
  0x73   : > { %1523 = vmatmul.mubr.bf16.gmra.mrb[36].mxu0 %v2822_v5  ;;  %1168 = vmatmul.mubr.bf16.gmra.mrb[36].mxu1 %v2928_v10  ;;  %v1837_v5 = vcombine.low %v214_v47, %v2969_v33  ;;  %v2591_v33 = vld [vmem:[%s3252_s1 + $0x238] sm:$0xff]  }
  0x74   : > { %1530 = vmatprep.mubr.bf16.mxu0 %v2932_v14  ;;  %2326 = vmatpush3.bf16.msra.mxu0 %v2582_v11  ;;  %v2588_v14 = vld [vmem:[%s3252_s1 + $0x230] sm:$0xff]  }
  0x75   : > { %2327 = vmatprep.subr.bf16.mxu0 %v2584_v44  ;;  %1175 = vmatprep.mubr.bf16.mxu1 %v3009_v13  ;;  %v476_v48 = vrot.slane %v1837_v5, 1 }
  0x78   : > { %2328 = vmatpush3.bf16.msra.mxu0 %v2584_v44 }
  0x79   : > { %2329 = vmatprep.subr.bf16.mxu0 %v2586_v36 }
  0x7b   : > { %1531 = vmatmul.mubr.bf16.gmra.mrb[40].mxu0 %v2886_v42  ;;  %1176 = vmatmul.mubr.bf16.gmra.mrb[40].mxu1 %v2966_v32  ;;  %v477_v42 = vrot.slane %v2973_v40, 1  ;;  %v1826_v40 = vcombine.low %v202_v55, %v203_v56 }
  0x7c   : > { %1538 = vmatprep.mubr.bf16.mxu0 %v2989_v58  ;;  %2330 = vmatpush3.bf16.msra.mxu0 %v2586_v36  ;;  %v2590_v58 = vld [vmem:[%s2752_s21 + $0x74] ss:$0 sps:$4 sm:$0x11]  }
  0x7d   : > { %2331 = vmatprep.subr.bf16.mxu0 %v2587_v34  ;;  %1183 = vmatprep.mubr.bf16.mxu1 %v3032_v35  ;;  %v478_v54 = vsel %vm475_vm0, %v476_v48, %v477_v42  ;;  %v426_v59 = vshll.u32 %v1826_v40, 16  ;;  %v431_v61 = vshll.u32 %v2590_v58, 16 }
  0x7f   : > { %v428_v60 = vrot.slane %v426_v59, 1  ;;  %v433_v63 = vrot.slane %v431_v61, 1 }
  0x80   : > { %2332 = vmatpush3.bf16.msra.mxu0 %v2587_v34 }
  0x81   : > { %2333 = vmatprep.subr.bf16.mxu0 %v2588_v14 }
  0x83   : > { %1539 = vmatmul.mubr.bf16.gmra.mrb[44].mxu0 %v2928_v10  ;;  %1184 = vmatmul.mubr.bf16.gmra.mrb[44].mxu1 %v2983_v51  ;;  %v424_v10 = vshrl.u32 %v1826_v40, 16 }
  0x84   : > { %1546 = vmatprep.mubr.bf16.mxu0 %v3009_v13  ;;  %2334 = vmatpush3.bf16.msra.mxu0 %v2588_v14 }
  0x85   : > { %2335 = vmatprep.subr.bf16.mxu0 %v2591_v33  ;;  %2305 = vmatprep.mubr.bf16.mxu1 %v478_v54 }
  0x88   : > { %2336 = vmatpush3.bf16.msra.mxu0 %v2591_v33 }
  0x8b   : > { %1547 = vmatmul.mubr.bf16.gmra.mrb[48].mxu0 %v2966_v32  ;;  %2306 = vmatmul.mubr.bf16.vlgmr.msra.gmra.mrb[0].mxu1 %v2793_v49  ;;  %v429_v32 = vor.u32 %v428_v60, %v424_v10 }
  0x8c   : > { %1554 = vmatprep.mubr.bf16.mxu0 %v3032_v35  ;;  %2361 = vmatpush3.bf16.msra.mxu1 %v3039_v52 }
  0x8d   : > { %2309 = vmatprep.mubr.bf16.mxu1 %v2803_v53  ;;  %2354 = vmatprep.subr.bf16.mxu1 %v2580_v46  ;;  %v434_v49 = vsel %vm314_vm1, %v429_v32, %v433_v63 }
  0x90   : > { %2362 = vmatpush3.bf16.msra.mxu1 %v2580_v46 }
  0x91   : > { %2355 = vmatprep.subr.bf16.mxu1 %v2582_v11 }
  0x93   : > { %1555 = vmatmul.mubr.bf16.gmra.mrb[52].mxu0 %v2983_v51  ;;  %2310 = vmatmul.mubr.bf16.gmra.mrb[4].mxu1 %v2835_v12  ;;  %v223_v51 = vld [vmem:[%s2752_s21 + $0x6c] sm:$0xe]  ;;  %s1813_s21 = sshll.u32 %s2615_s9, 3 }
  0x94   : > { %1562 = vmatprep.mubr.bf16.mxu0 %v3048_v38  ;;  %2363 = vmatpush3.bf16.msra.mxu1 %v2582_v11  ;;  %p175_p7 = scmp.lt.s32.totalorder %s1813_s21, 15 }
  0x95   : > { %2313 = vmatprep.mubr.bf16.mxu1 %v2845_v17  ;;  %2356 = vmatprep.subr.bf16.mxu1 %v2584_v44 }
  0x96   : > { %s3267_s21 = smov (!%p175_p7, %s1813_s21), 15 }
  0x97   : > { %s1814_s9 = sshll.u32 %s3267_s21, 1 }
  0x98   : > { %2364 = vmatpush3.bf16.msra.mxu1 %v2584_v44  ;;  %s179_s27 = sadd.s32 %s1815_s26, %s1814_s9 }
  0x99   : > { %2357 = vmatprep.subr.bf16.mxu1 %v2586_v36  ;;  %s1816_s28 = sshll.u32 %s179_s27, 3 }
  0x9a   : > { %s3216_s3 = scalar_lea.vmem %s3253_s2, %s1816_s28 }
  0x9b   : > { %1563 = vmatmul.mubr.bf16.gmra.mrb[56].mxu0 %v2992_v0  ;;  %2314 = vmatmul.mubr.bf16.gmra.mrb[8].mxu1 %v2889_v43  ;;  %v1846_v0 = vcombine.low %v223_v51, %v203_v56 }
  0x9c   : > { %1570 = vmatprep.mubr.bf16.mxu0 %v434_v49  ;;  %2365 = vmatpush3.bf16.msra.mxu1 %v2586_v36 }
  0x9d   : > { %2317 = vmatprep.mubr.bf16.mxu1 %v2901_v50  ;;  %2358 = vmatprep.subr.bf16.mxu1 %v2587_v34  ;;  %v503_v57 = vrot.slane %v1846_v0, 1 }
  0xa0   : > { %2366 = vmatpush3.bf16.msra.mxu1 %v2587_v34 }
  0xa1   : > { %2359 = vmatprep.subr.bf16.mxu1 %v2588_v14 }
  0xa3   : > { %1571 = vmatmul.mubr.bf16.gmra.mrb[60].mxu0 %v1826_v40  ;;  %2318 = vmatmul.mubr.bf16.gmra.mrb[12].mxu1 %v2935_v15 }
  0xa4   : > { %2337 = vmatprep.mubr.bf16.mxu0 %v2803_v53  ;;  %2367 = vmatpush3.bf16.msra.mxu1 %v2588_v14  ;;  %v504_v53 = vrot.slane %v2590_v58, 1 }
  0xa5   : > { %2345 = vmatprep.mubr.bf16.mxu1 %v2901_v50  ;;  %2360 = vmatprep.subr.bf16.mxu1 %v2591_v33 }
  0xa6   : > { %v505_v2 = vsel %vm475_vm0, %v503_v57, %v504_v53 }
  0xa8   : > { %2368 = vmatpush3.bf16.msra.mxu1 %v2591_v33 }
  0xab   : > { %2338 = vmatmul.mubr.bf16.vlgmr.msra.gmra.mrb[64].mxu0 %v2835_v12  ;;  %2346 = vmatmul.mubr.bf16.vlgmr.msra.gmra.mrb[8].mxu1 %v2935_v15 }
  0xac   : > { %2341 = vmatprep.mubr.bf16.mxu0 %v2845_v17  ;;  %2349 = vmatprep.mubr.bf16.mxu1 %v2948_v21 }
  0xb3   : > { %2342 = vmatmul.mubr.bf16.gmra.mrb[68].mxu0 %v2889_v43  ;;  %2350 = vmatmul.mubr.bf16.gmra.mrb[12].mxu1 %v505_v2 }
  0xfe   : > { %v2033_v50 = vpop.f32.mrb[0].mxu0 }
  0xff   : > { %v2034_v39 = vpop.f32.mrb[1].mxu0 }
 0x100   : > { %v2035_v3 = vadd.f32 %v2034_v39, %v2033_v50  ;;  %v2036_v4 = vpop.f32.mrb[2].mxu0 }
 0x101   : > { %v2037_v12 = vpop.f32.mrb[3].mxu0 }
 0x102   : > { %v2038_v6 = vadd.f32 %v2037_v12, %v2036_v4 }
 0x106   : > { %v2039_v1 = vpop.f32.mrb[4].mxu0 }
 0x107   : > { %v2040_v17 = vpop.f32.mrb[5].mxu0 }
 0x108   : > { %v2041_v8 = vadd.f32 %v2040_v17, %v2039_v1  ;;  %v2042_v9 = vpop.f32.mrb[6].mxu0 }
 0x109   : > { %v2043_v15 = vpop.f32.mrb[7].mxu0 }
 0x10a   : > { %v2044_v13 = vadd.f32 %v2043_v15, %v2042_v9 }
 0x10e   : > { %v2045_v21 = vpop.f32.mrb[8].mxu0 }
 0x10f   : > { %v2046_v16 = vpop.f32.mrb[9].mxu0 }
 0x110   : > { %v2047_v18 = vadd.f32 %v2046_v16, %v2045_v21  ;;  %v2048_v19 = vpop.f32.mrb[10].mxu0 }
 0x111   : > { %v2049_v43 = vpop.f32.mrb[11].mxu0 }
 0x112   : > { %v2050_v20 = vadd.f32 %v2049_v43, %v2048_v19 }
 0x116   : > { %v2051_v62 = vpop.f32.mrb[12].mxu0 }
 0x117   : > { %v2052_v22 = vpop.f32.mrb[13].mxu0 }
 0x118   : > { %v2053_v23 = vadd.f32 %v2052_v22, %v2051_v62  ;;  %v2054_v24 = vpop.f32.mrb[14].mxu0 }
 0x119   : > { %v2055_v26 = vpop.f32.mrb[15].mxu0 }
 0x11a   : > { %v2056_v27 = vadd.f32 %v2055_v26, %v2054_v24 }
 0x11e   : > { %v2057_v28 = vpop.f32.mrb[16].mxu0  ;;  %v2113_v30 = vpop.f32.mrb[16].mxu1 }
 0x11f   : > { %v2058_v29 = vpop.f32.mrb[17].mxu0  ;;  %v2114_v38 = vpop.f32.mrb[17].mxu1 }
 0x120   : > { %v3138_v35 = vadd.f32 %v2058_v29, %v2057_v28  ;;  %v2060_v52 = vpop.f32.mrb[18].mxu0  ;;  %v2115_v31 = vadd.f32 %v2114_v38, %v2113_v30  ;;  %v2116_v25 = vpop.f32.mrb[18].mxu1 }
 0x121   : > { %v2061_v7 = vpop.f32.mrb[19].mxu0  ;;  %v2117_v41 = vpop.f32.mrb[19].mxu1 }
 0x122   : > { %v3140_v37 = vadd.f32 %v2061_v7, %v2060_v52  ;;  %v2118_v45 = vadd.f32 %v2117_v41, %v2116_v25  ;;  %v3142_v11 = vadd.f32 %v2115_v31, %v2035_v3 }
 0x124   : > { %v3146_v47 = vadd.f32 %v2118_v45, %v2038_v6 }
 0x126   : > { %v2063_v46 = vpop.f32.mrb[20].mxu0  ;;  %v2119_v14 = vpop.f32.mrb[20].mxu1 }
 0x127   : > { %v2064_v44 = vpop.f32.mrb[21].mxu0  ;;  %v2120_v42 = vpop.f32.mrb[21].mxu1 }
 0x128   : > { %v3144_v36 = vadd.f32 %v2064_v44, %v2063_v46  ;;  %v2066_v34 = vpop.f32.mrb[22].mxu0  ;;  %v2121_v33 = vadd.f32 %v2120_v42, %v2119_v14  ;;  %v2122_v54 = vpop.f32.mrb[22].mxu1 }
 0x129   : > { %v2067_v5 = vpop.f32.mrb[23].mxu0  ;;  %v2123_v55 = vpop.f32.mrb[23].mxu1 }
 0x12a   : > { %v3148_v48 = vadd.f32 %v2067_v5, %v2066_v34  ;;  %v2124_v56 = vadd.f32 %v2123_v55, %v2122_v54  ;;  %v3150_v58 = vadd.f32 %v2121_v33, %v2041_v8 }
 0x12c   : > { %v3154_v61 = vadd.f32 %v2124_v56, %v2044_v13 }
 0x12e   : > { %v2069_v40 = vpop.f32.mrb[24].mxu0  ;;  %v2125_v63 = vpop.f32.mrb[24].mxu1 }
 0x12f   : > { %v2070_v59 = vpop.f32.mrb[25].mxu0  ;;  %v2126_v51 = vpop.f32.mrb[25].mxu1 }
 0x130   : > { %v3152_v10 = vadd.f32 %v2070_v59, %v2069_v40  ;;  %v2072_v60 = vpop.f32.mrb[26].mxu0  ;;  %v2127_v0 = vadd.f32 %v2126_v51, %v2125_v63  ;;  %v2128_v57 = vpop.f32.mrb[26].mxu1 }
 0x131   : > { %v2073_v32 = vpop.f32.mrb[27].mxu0  ;;  %v2129_v53 = vpop.f32.mrb[27].mxu1 }
 0x132   : > { %v3156_v49 = vadd.f32 %v2073_v32, %v2072_v60  ;;  %v2130_v2 = vadd.f32 %v2129_v53, %v2128_v57  ;;  %v3158_v39 = vadd.f32 %v2127_v0, %v2047_v18 }
 0x134   : > { %v3162_v6 = vadd.f32 %v2130_v2, %v2050_v20 }
 0x136   : > { %v2075_v50 = vpop.f32.mrb[28].mxu0  ;;  %v2131_v17 = vpop.f32.mrb[28].mxu1 }
 0x137   : > { %v2076_v3 = vpop.f32.mrb[29].mxu0  ;;  %v2132_v9 = vpop.f32.mrb[29].mxu1 }
 0x138   : > { %v3160_v4 = vadd.f32 %v2076_v3, %v2075_v50  ;;  %v2078_v12 = vpop.f32.mrb[30].mxu0  ;;  %v2133_v15 = vadd.f32 %v2132_v9, %v2131_v17  ;;  %v2134_v13 = vpop.f32.mrb[30].mxu1 }
 0x139   : > { %v2079_v1 = vpop.f32.mrb[31].mxu0  ;;  %v2135_v21 = vpop.f32.mrb[31].mxu1 }
 0x13a   : > { %v3164_v8 = vadd.f32 %v2079_v1, %v2078_v12  ;;  %v2136_v16 = vadd.f32 %v2135_v21, %v2134_v13  ;;  %v3166_v43 = vadd.f32 %v2133_v15, %v2053_v23 }
 0x13c   : > { %v3170_v24 = vadd.f32 %v2136_v16, %v2056_v27 }
 0x13e   : > { %v2193_v19 = vpop.f32.mrb[32].mxu0  ;;  %v2137_v26 = vpop.f32.mrb[32].mxu1 }
 0x13f   : > { %v2194_v18 = vpop.f32.mrb[33].mxu0  ;;  %v2138_v29 = vpop.f32.mrb[33].mxu1 }
 0x140   : > { %v3168_v62 = vadd.f32 %v2194_v18, %v2193_v19  ;;  %v2196_v22 = vpop.f32.mrb[34].mxu0  ;;  %v2139_v52 = vadd.f32 %v2138_v29, %v2137_v26  ;;  %v2140_v7 = vpop.f32.mrb[34].mxu1 }
 0x141   : > { %v2197_v20 = vpop.f32.mrb[35].mxu0  ;;  %v2141_v30 = vpop.f32.mrb[35].mxu1 }
 0x142   : > { %v3172_v28 = vadd.f32 %v2197_v20, %v2196_v22  ;;  %v2404_v38 = vadd.f32 %v2139_v52, %v3138_v35  ;;  %v2142_v31 = vadd.f32 %v2141_v30, %v2140_v7 }
 0x144   : > { %v2410_v41 = vadd.f32 %v2142_v31, %v3140_v37 }
 0x146   : > { %v2199_v25 = vpop.f32.mrb[36].mxu0  ;;  %v2143_v27 = vpop.f32.mrb[36].mxu1 }
 0x147   : > { %v2200_v23 = vpop.f32.mrb[37].mxu0  ;;  %v2144_v5 = vpop.f32.mrb[37].mxu1 }
 0x148   : > { %v2201_v45 = vadd.f32 %v2200_v23, %v2199_v25  ;;  %v2202_v46 = vpop.f32.mrb[38].mxu0  ;;  %v2145_v14 = vadd.f32 %v2144_v5, %v2143_v27  ;;  %v2146_v42 = vpop.f32.mrb[38].mxu1 }
 0x149   : > { %v2203_v44 = vpop.f32.mrb[39].mxu0  ;;  %v2147_v33 = vpop.f32.mrb[39].mxu1 }
 0x14a   : > { %v2204_v34 = vadd.f32 %v2203_v44, %v2202_v46  ;;  %v2401_v54 = vadd.f32 %v2145_v14, %v3144_v36  ;;  %v2148_v55 = vadd.f32 %v2147_v33, %v2146_v42 }
 0x14c   : > { %v2407_v35 = vadd.f32 %v2148_v55, %v3148_v48 }
 0x14e   : > { %v2205_v56 = vpop.f32.mrb[40].mxu0  ;;  %v2149_v32 = vpop.f32.mrb[40].mxu1 }
 0x14f   : > { %v2206_v40 = vpop.f32.mrb[41].mxu0  ;;  %v2150_v51 = vpop.f32.mrb[41].mxu1 }
 0x150   : > { %v3178_v59 = vadd.f32 %v2206_v40, %v2205_v56  ;;  %v2208_v60 = vpop.f32.mrb[42].mxu0  ;;  %v2151_v0 = vadd.f32 %v2150_v51, %v2149_v32  ;;  %v2152_v57 = vpop.f32.mrb[42].mxu1 }
 0x151   : > { %v2209_v37 = vpop.f32.mrb[43].mxu0  ;;  %v2153_v53 = vpop.f32.mrb[43].mxu1 }
 0x152   : > { %v3180_v63 = vadd.f32 %v2209_v37, %v2208_v60  ;;  %v3183_v2 = vadd.f32 %v2151_v0, %v3152_v10  ;;  %v2154_v36 = vadd.f32 %v2153_v53, %v2152_v57 }
 0x154   : > { %v3186_v12 = vadd.f32 %v2154_v36, %v3156_v49 }
 0x156   : > { %v2211_v50 = vpop.f32.mrb[44].mxu0  ;;  %v2155_v9 = vpop.f32.mrb[44].mxu1 }
 0x157   : > { %v2212_v3 = vpop.f32.mrb[45].mxu0  ;;  %v2156_v13 = vpop.f32.mrb[45].mxu1 }
 0x158   : > { %v2213_v48 = vadd.f32 %v2212_v3, %v2211_v50  ;;  %v2214_v1 = vpop.f32.mrb[46].mxu0  ;;  %v2157_v21 = vadd.f32 %v2156_v13, %v2155_v9  ;;  %v2158_v16 = vpop.f32.mrb[46].mxu1 }
 0x159   : > { %v2215_v17 = vpop.f32.mrb[47].mxu0  ;;  %v2159_v19 = vpop.f32.mrb[47].mxu1 }
 0x15a   : > { %v2216_v15 = vadd.f32 %v2215_v17, %v2214_v1  ;;  %v3189_v18 = vadd.f32 %v2157_v21, %v3160_v4  ;;  %v2160_v10 = vadd.f32 %v2159_v19, %v2158_v16 }
 0x15c   : > { %v2419_v26 = vadd.f32 %v2160_v10, %v3164_v8 }
 0x15e   : > { %v2217_v22 = vpop.f32.mrb[48].mxu0  ;;  %v2307_v7 = vpop.f32.mrb[0].mxu1 }
 0x15f   : > { %v2218_v20 = vpop.f32.mrb[49].mxu0  ;;  %v2370_v25 = vadd.f32 %v3150_v58, %v2307_v7  ;;  %v1226_v23 = vpop.f32.mrb[1].mxu1 }
 0x160   : > { %v2219_v29 = vadd.f32 %v2218_v20, %v2217_v22  ;;  %v2220_v49 = vpop.f32.mrb[50].mxu0  ;;  %v2374_v46 = vadd.f32 %v3142_v11, %v1226_v23  ;;  %v2308_v44 = vpop.f32.mrb[2].mxu1 }
 0x161   : > { %v2221_v52 = vpop.f32.mrb[51].mxu0  ;;  %v2378_v27 = vadd.f32 %v3154_v61, %v2308_v44  ;;  %v1229_v5 = vpop.f32.mrb[3].mxu1  ;;  %v2371_v8 = vadd.f32 %v2370_v25, %v2201_v45 }
 0x162   : > { %v2222_v30 = vadd.f32 %v2221_v52, %v2220_v49  ;;  %v3192_v31 = vadd.f32 %v2404_v38, %v2219_v29  ;;  %v2382_v14 = vadd.f32 %v3146_v47, %v1229_v5  ;;  %v2375_v33 = vadd.f32 %v2374_v46, %v3168_v62 }
 0x163   : > { %v2379_v55 = vadd.f32 %v2378_v27, %v2204_v34 }
 0x164   : > { %v3196_v4 = vadd.f32 %v2410_v41, %v2222_v30  ;;  %v2383_v40 = vadd.f32 %v2382_v14, %v3172_v28 }
 0x166   : > { %v2223_v42 = vpop.f32.mrb[52].mxu0  ;;  %v2311_v60 = vpop.f32.mrb[4].mxu1 }
 0x167   : > { %v2224_v38 = vpop.f32.mrb[53].mxu0  ;;  %v2386_v61 = vadd.f32 %v3166_v43, %v2311_v60  ;;  %v1242_v32 = vpop.f32.mrb[5].mxu1 }
 0x168   : > { %v2225_v56 = vadd.f32 %v2224_v38, %v2223_v42  ;;  %v2226_v58 = vpop.f32.mrb[54].mxu0  ;;  %v2390_v45 = vadd.f32 %v3158_v39, %v1242_v32  ;;  %v2312_v47 = vpop.f32.mrb[6].mxu1 }
 0x169   : > { %v2227_v11 = vpop.f32.mrb[55].mxu0  ;;  %v2394_v62 = vadd.f32 %v3170_v24, %v2312_v47  ;;  %v1245_v0 = vpop.f32.mrb[7].mxu1  ;;  %v2387_v34 = vadd.f32 %v2386_v61, %v2213_v48 }
 0x16a   : > { %v2228_v37 = vadd.f32 %v2227_v11, %v2226_v58  ;;  %v2402_v41 = vadd.f32 %v2401_v54, %v2225_v56  ;;  %v2398_v28 = vadd.f32 %v3162_v6, %v1245_v0  ;;  %v2391_v53 = vadd.f32 %v2390_v45, %v3178_v59 }
 0x16b   : > { %v2395_v54 = vadd.f32 %v2394_v62, %v2216_v15 }
 0x16c   : > { %v2408_v51 = vadd.f32 %v2407_v35, %v2228_v37  ;;  %v2399_v3 = vadd.f32 %v2398_v28, %v3180_v63 }
 0x16e   : > { %v2229_v57 = vpop.f32.mrb[56].mxu0 }
 0x16f   : > { %v2230_v36 = vpop.f32.mrb[57].mxu0 }
 0x170   : > { %v2231_v50 = vadd.f32 %v2230_v36, %v2229_v57  ;;  %v2232_v43 = vpop.f32.mrb[58].mxu0 }
 0x171   : > { %v2233_v39 = vpop.f32.mrb[59].mxu0 }
 0x172   : > { %v2234_v35 = vadd.f32 %v2233_v39, %v2232_v43  ;;  %v2417_v24 = vadd.f32 %v3183_v2, %v2231_v50 }
 0x174   : > { %v2423_v1 = vadd.f32 %v3186_v12, %v2234_v35 }
 0x176   : > { %v2235_v48 = vpop.f32.mrb[60].mxu0 }
 0x177   : > { %v2236_v6 = vpop.f32.mrb[61].mxu0 }
 0x178   : > { %v2237_v17 = vadd.f32 %v2236_v6, %v2235_v48  ;;  %v2238_v9 = vpop.f32.mrb[62].mxu0 }
 0x179   : > { %v2239_v59 = vpop.f32.mrb[63].mxu0 }
 0x17a   : > { %v2240_v15 = vadd.f32 %v2239_v59, %v2238_v9  ;;  %v2414_v13 = vadd.f32 %v3189_v18, %v2237_v17 }
 0x17c   : > { %v2420_v63 = vadd.f32 %v2419_v26, %v2240_v15 }
 0x17e   : > { %v2339_v2 = vpop.f32.mrb[64].mxu0  ;;  %v2347_v22 = vpop.f32.mrb[8].mxu1 }
 0x17f   : > { %v2372_v12 = vadd.f32 %v2371_v8, %v2339_v2  ;;  %v1613_v21 = vpop.f32.mrb[65].mxu0  ;;  %v2403_v26 = vadd.f32 %v2402_v41, %v2347_v22  ;;  %v1645_v29 = vpop.f32.mrb[9].mxu1 }
 0x180   : > { %v2376_v16 = vadd.f32 %v2375_v33, %v1613_v21  ;;  %v2340_v19 = vpop.f32.mrb[66].mxu0  ;;  %v2406_v49 = vadd.f32 %v3192_v31, %v1645_v29  ;;  %v2348_v52 = vpop.f32.mrb[10].mxu1 }
 0x181   : > { %1694 = vst [vmem:[%s3216_s3 + $0x10] sm:$0xff] %v2372_v12  ;;  %v2380_v18 = vadd.f32 %v2379_v55, %v2340_v19  ;;  %v1616_v10 = vpop.f32.mrb[67].mxu0  ;;  %1702 = vst [vmem:[%s3216_s3 + $0x50] sm:$0xff] %v2403_v26  ;;  %v2409_v7 = vadd.f32 %v2408_v51, %v2348_v52  ;;  %v1648_v30 = vpop.f32.mrb[11].mxu1 }
 0x182   : > { %1692 = vst [vmem:[%s3216_s3] sm:$0xff] %v2376_v16  ;;  %v2384_v20 = vadd.f32 %v2383_v40, %v1616_v10  ;;  %1700 = vst [vmem:[%s3216_s3 + $0x40] sm:$0xff] %v2406_v49  ;;  %v2412_v25 = vadd.f32 %v3196_v4, %v1648_v30 }
 0x183   : > { %1695 = vst [vmem:[%s3216_s3 + $0x18] sm:$0xff] %v2380_v18  ;;  %1703 = vst [vmem:[%s3216_s3 + $0x58] sm:$0xff] %v2409_v7 }
 0x184   : > { %1693 = vst [vmem:[%s3216_s3 + $0x8] sm:$0xff] %v2384_v20  ;;  %1701 = vst [vmem:[%s3216_s3 + $0x48] sm:$0xff] %v2412_v25 }
 0x186   : > { %v2343_v23 = vpop.f32.mrb[68].mxu0  ;;  %v2351_v14 = vpop.f32.mrb[12].mxu1 }
 0x187   : > { %v2388_v46 = vadd.f32 %v2387_v34, %v2343_v23  ;;  %v1629_v44 = vpop.f32.mrb[69].mxu0  ;;  %v2415_v4 = vadd.f32 %v2414_v13, %v2351_v14  ;;  %v1661_v33 = vpop.f32.mrb[13].mxu1 }
 0x188   : > { %v2392_v27 = vadd.f32 %v2391_v53, %v1629_v44  ;;  %v2344_v5 = vpop.f32.mrb[70].mxu0  ;;  %v2418_v38 = vadd.f32 %v2417_v24, %v1661_v33  ;;  %v2352_v55 = vpop.f32.mrb[14].mxu1 }
 0x189   : > { %1698 = vst [vmem:[%s3216_s3 + $0x30] sm:$0xff] %v2388_v46  ;;  %v2396_v31 = vadd.f32 %v2395_v54, %v2344_v5  ;;  %v1632_v8 = vpop.f32.mrb[71].mxu0  ;;  %1706 = vst [vmem:[%s3216_s3 + $0x70] sm:$0xff] %v2415_v4  ;;  %v2421_v56 = vadd.f32 %v2420_v63, %v2352_v55  ;;  %v1664_v58 = vpop.f32.mrb[15].mxu1 }
 0x18a   : > { %1696 = vst [vmem:[%s3216_s3 + $0x20] sm:$0xff] %v2392_v27  ;;  %v2400_v42 = vadd.f32 %v2399_v3, %v1632_v8  ;;  %1704 = vst [vmem:[%s3216_s3 + $0x60] sm:$0xff] %v2418_v38  ;;  %v2424_v40 = vadd.f32 %v2423_v1, %v1664_v58 }
 0x18b   : > { %1699 = vst [vmem:[%s3216_s3 + $0x38] sm:$0xff] %v2396_v31  ;;  %1707 = vst [vmem:[%s3216_s3 + $0x78] sm:$0xff] %v2421_v56 }
 0x18c   : > { %1697 = vst [vmem:[%s3216_s3 + $0x28] sm:$0xff] %v2400_v42  ;;  %1705 = vst [vmem:[%s3216_s3 + $0x68] sm:$0xff] %v2424_v40 }
 0x18d PF: > { %s12_s13 = sadd.s32 1, %s2631_s13   ;;  %s3254_s9 = smov %s2623_s11 }
 0x18e   : > { %p9_p8 = scmp.ge.s32.totalorder %s12_s13, 6   ;;  %s3255_s10 = smov %s2627_s12 }
 0x18f   : > { %s3256_s11 = smov %s3259_s14  ;;  %s3257_s12 = smov %s3263_s15 }
 0x190   :  { %11 = sbr.rel (!%p9_p8) target bundleno = 3 (0x3), region = 60 }

</bundles_post_ra>
